<compile_context>
chip_gen: v6e
topology: v6e:2x2x1
jax: 0.10.0
libtpu: 0.0.40
codegen_flags: <defaults>
</compile_context>

<pallas_src>
import jax
import jax.numpy as jnp
import numpy as np
from jax import lax
from jax.experimental import pallas as pl
from jax.experimental.pallas import tpu as pltpu


# ---------------------------------------------------------------------------
# Kernel bodies
# ---------------------------------------------------------------------------
def _conv_relu(x_ref, wc_ref, bias_ref):
    """1x1 conv (BN scale folded into wc) + BN shift + ReLU.  (Cout, s_tile) f32."""
    y = jnp.dot(wc_ref[...], x_ref[0], preferred_element_type=jnp.float32)
    return jnp.maximum(y + bias_ref[...], 0.0)


def _gate_from_sum(sum_col, w1_ref, w2_ref, inv_s):
    """SE gate from the per-channel sum.  sum_col: (Cout, 1) f32."""
    mean = sum_col * inv_s                                            # (Cout, 1)
    h = jnp.maximum(
        jnp.dot(w1_ref[...], mean, preferred_element_type=jnp.float32), 0.0)  # (Mid, 1)
    return jax.nn.sigmoid(
        jnp.dot(w2_ref[...], h, preferred_element_type=jnp.float32))          # (Cout, 1)


def _make_kernel_resident(s_true, s_tile):
    """Resident-y path: x is read from HBM exactly once."""
    inv_s = 1.0 / float(s_true)

    def kernel(x_ref, wc_ref, bias_ref, w1_ref, w2_ref, o_ref,
               y_scr, sum_ref, gate_ref):
        # x_ref:    (1, Cin, s_tile)       pinned at the last tile during pass 1
        # o_ref:    (1, Cout, s_tile)
        # y_scr:    (Cout, n_s*s_tile)     whole-batch-element ReLU'd conv output
        # sum_ref:  (Cout, 1) f32          channel-sum accumulator
        # gate_ref: (Cout, 1) f32          sigmoid gate
        p = pl.program_id(1)               # 0 = squeeze + stash, 1 = gate + store
        s = pl.program_id(2)
        n_s = pl.num_programs(2)

        @pl.when(p == 0)
        def _pass0():
            y = _conv_relu(x_ref, wc_ref, bias_ref)
            # Edge tiles read unspecified padding past the true spatial extent;
            # zero those columns so they reach neither the mean nor the output.
            col = s * s_tile + lax.broadcasted_iota(jnp.int32, y.shape, 1)
            y = jnp.where(col < s_true, y, 0.0)

            start = pl.multiple_of(s * s_tile, s_tile)
            y_scr[:, pl.ds(start, s_tile)] = y.astype(y_scr.dtype)

            @pl.when(s == 0)
            def _():
                sum_ref[...] = jnp.zeros_like(sum_ref)
            sum_ref[...] += jnp.sum(y, axis=1, keepdims=True)

            # Gate is computed exactly once per batch element.
            @pl.when(s == n_s - 1)
            def _():
                gate_ref[...] = _gate_from_sum(sum_ref[...], w1_ref, w2_ref, inv_s)

        @pl.when(p == 1)
        def _pass1():
            start = pl.multiple_of(s * s_tile, s_tile)
            y = y_scr[:, pl.ds(start, s_tile)].astype(jnp.float32)
            o_ref[0] = (y * gate_ref[...]).astype(o_ref.dtype)

    return kernel


def _make_kernel_recompute(s_true, s_tile):
    """Fallback for very large S: pass 1 re-reads x and recomputes the conv."""
    inv_s = 1.0 / float(s_true)

    def kernel(x_ref, wc_ref, bias_ref, w1_ref, w2_ref, o_ref,
               sum_ref, gate_ref):
        p = pl.program_id(1)
        s = pl.program_id(2)
        n_s = pl.num_programs(2)

        y = _conv_relu(x_ref, wc_ref, bias_ref)

        @pl.when(p == 0)
        def _pass0():
            col = s * s_tile + lax.broadcasted_iota(jnp.int32, y.shape, 1)
            ym = jnp.where(col < s_true, y, 0.0)

            @pl.when(s == 0)
            def _():
                sum_ref[...] = jnp.zeros_like(sum_ref)
            sum_ref[...] += jnp.sum(ym, axis=1, keepdims=True)

            @pl.when(s == n_s - 1)
            def _():
                gate_ref[...] = _gate_from_sum(sum_ref[...], w1_ref, w2_ref, inv_s)

        @pl.when(p == 1)
        def _pass1():
            # Padded edge columns are dropped by the masked partial store.
            o_ref[0] = (y * gate_ref[...]).astype(o_ref.dtype)

    return kernel


# ---------------------------------------------------------------------------
# Planning helpers
# ---------------------------------------------------------------------------
def _vmem_limit_bytes():
    """Per-generation VMEM budget (~3/4 of physical, capped at 96 MiB).
    v5e/v6e: 128 MiB physical -> 96 MiB;  v7x: 64 MiB/TC -> 48 MiB."""
    total = 64 * 1024 * 1024          # conservative default (v7x per-core)
    try:
        info = pltpu.get_tpu_info()
        total = int(getattr(info, "vmem_capacity_bytes", total))
    except Exception:
        pass
    return int(min(max(total * 3 // 4, 32 * 1024 * 1024), 96 * 1024 * 1024))


def _plan(S, Cin, Cout, x_item, out_item, y_item, vmem_limit, x_bufs,
          s_tile=None, resident=None):
    """Pick (s_tile, resident_y) so that streamed buffers + scratch fit VMEM.
    Prefers the resident-y path (x read once) and the largest legal tile."""
    budget = max(vmem_limit - 2 * 1024 * 1024, 4 * 1024 * 1024)

    def footprint(t, res):
        n_s = pl.cdiv(S, t)
        f = x_bufs * Cin * t * x_item + 2 * Cout * t * out_item
        if res:
            f += Cout * n_s * t * y_item
        return f

    if s_tile is not None:
        assert s_tile == S or s_tile % 128 == 0, \
            "s_tile must equal H*W or be a multiple of 128"
        if resident is None:
            resident = footprint(s_tile, True) <= budget
        return s_tile, resident

    if S <= 128:
        cands = [S]
    else:
        cands = list(range((S // 128) * 128, 0, -128))
        if S % 128 != 0:
            cands = [S] + cands        # full-extent tile is always legal

    def pick(res):
        for t in cands:
            if footprint(t, res) <= budget:
                return t
        return None

    if resident is None or resident:
        t = pick(True)
        if t is not None:
            return t, True
        if resident:                    # explicitly requested: best effort
            return cands[-1], True
    t = pick(False)
    return (t if t is not None else cands[-1]), False


# ---------------------------------------------------------------------------
# pallas_call builder + public wrapper
# ---------------------------------------------------------------------------
def _build_call(B, Cin, Cout, Mid, S, s_tile, n_s, resident, out_dtype,
                y_dtype, vmem_limit, buffered):
    def x_index(b, p, s):
        if resident:
            # Pass 0 streams tiles; pass 1 stays pinned on the last tile so no
            # re-DMA happens (x is read from HBM exactly once per batch elem).
            return (b, 0, s * (1 - p) + (n_s - 1) * p)
        return (b, 0, s)

    if buffered:
        # Deeper pipelining on the only streamed input (per-tile compute is
        # much cheaper than the tile DMA).
        x_spec = pl.BlockSpec((1, Cin, s_tile), x_index,
                              pipeline_mode=pl.Buffered(3))
    else:
        x_spec = pl.BlockSpec((1, Cin, s_tile), x_index)

    in_specs = [
        x_spec,
        pl.BlockSpec((Cout, Cin), lambda b, p, s: (0, 0)),   # resident weights
        pl.BlockSpec((Cout, 1), lambda b, p, s: (0, 0)),
        pl.BlockSpec((Mid, Cout), lambda b, p, s: (0, 0)),
        pl.BlockSpec((Cout, Mid), lambda b, p, s: (0, 0)),
    ]
    # Pass 0: output block index pinned at tile 0 (no spurious writebacks);
    # pass 1: streams lane-dense output tiles.
    out_specs = pl.BlockSpec((1, Cout, s_tile), lambda b, p, s: (b, 0, p * s))

    scratch = []
    if resident:
        scratch.append(pltpu.VMEM((Cout, n_s * s_tile), y_dtype))
    scratch += [pltpu.VMEM((Cout, 1), jnp.float32),   # channel-sum accumulator
                pltpu.VMEM((Cout, 1), jnp.float32)]   # sigmoid gate

    kernel = (_make_kernel_resident(S, s_tile) if resident
              else _make_kernel_recompute(S, s_tile))

    return pl.pallas_call(
        kernel,
        out_shape=jax.ShapeDtypeStruct((B, Cout, S), out_dtype),
        grid_spec=pltpu.PrefetchScalarGridSpec(
            num_scalar_prefetch=0,
            grid=(B, 2, n_s),
            in_specs=in_specs,
            out_specs=out_specs,
            scratch_shapes=scratch,
        ),
        compiler_params=pltpu.CompilerParams(
            # The pass and S axes carry scratch state (sum/gate/y) and MUST
            # remain "arbitrary" (sequential); only the batch axis is parallel.
            dimension_semantics=("parallel", "arbitrary", "arbitrary"),
            vmem_limit_bytes=int(vmem_limit),
        ),
    )


def ga_edgeconv_attn(x_nchw, conv_w, bn_gamma, bn_beta, bn_mean, bn_var,
                     fc1_w, fc2_w, eps=1e-5,
                     compute_dtype=jnp.bfloat16,   # production default: bf16 streaming
                     out_dtype=jnp.float32,
                     s_tile=None, resident_y=None, multibuffer=True):
    """x_nchw: (B, Cin, H, W).  conv_w: (Cout, Cin) (1x1 conv weight squeezed).
    fc1_w: (Mid, Cout), fc2_w: (Cout, Mid) -- PyTorch Linear weight layouts.
    compute_dtype: dtype for streamed activations / conv weight (bf16 halves
    HBM read traffic; MXU accumulation and the SE gate stay f32)."""
    B, Cin, H, W = x_nchw.shape
    Cout = conv_w.shape[0]
    Mid = fc1_w.shape[0]
    S = H * W

    # (B, Cin, H, W) -> (B, Cin, S): pure reshape, no transpose / HBM round trip.
    x = x_nchw.reshape(B, Cin, S).astype(compute_dtype)

    # Fold eval-mode BatchNorm into the bias-free 1x1 conv:
    #   BN(Wx) = scale*(Wx) + (beta - scale*mean),  scale = gamma/sqrt(var+eps)
    scale = (bn_gamma / jnp.sqrt(bn_var + eps)).astype(jnp.float32)           # (Cout,)
    wc = (conv_w.astype(jnp.float32) * scale[:, None]).astype(compute_dtype)  # (Cout,Cin)
    bias = (bn_beta - bn_mean * scale).reshape(Cout, 1).astype(jnp.float32)

    w1 = fc1_w.astype(jnp.float32)     # (Mid, Cout)
    w2 = fc2_w.astype(jnp.float32)     # (Cout, Mid)

    x_item = jnp.dtype(compute_dtype).itemsize
    out_item = jnp.dtype(out_dtype).itemsize
    f32 = jnp.dtype(compute_dtype) == jnp.dtype(jnp.float32)
    y_dtype = jnp.float32 if f32 else compute_dtype     # bf16 scratch halves VMEM
    y_item = jnp.dtype(y_dtype).itemsize

    vmem_limit = _vmem_limit_bytes()
    s_tile, resident = _plan(S, Cin, Cout, x_item, out_item, y_item,
                             vmem_limit, x_bufs=3 if multibuffer else 2,
                             s_tile=s_tile, resident=resident_y)
    n_s = pl.cdiv(S, s_tile)

    def run(buffered):
        call = _build_call(B, Cin, Cout, Mid, S, s_tile, n_s, resident,
                           out_dtype, y_dtype, vmem_limit, buffered)
        return call(x, wc, bias, w1, w2)

    out = None
    if multibuffer:
        try:
            out = run(True)
        except Exception:
            out = None          # this JAX build rejects pipeline_mode; fall back
    if out is None:
        out = run(False)

    return out.reshape(B, Cout, H, W)


# ---------------------------------------------------------------------------
# Pure-JAX reference (matches the PyTorch forward, eval-mode BN)
# ---------------------------------------------------------------------------
def _reference(x_nchw, conv_w, bn_gamma, bn_beta, bn_mean, bn_var,
               fc1_w, fc2_w, eps=1e-5):
    y = jnp.einsum("bchw,oc->bohw", x_nchw, conv_w)          # 1x1 conv
    scale = bn_gamma / jnp.sqrt(bn_var + eps)
    y = y * scale[None, :, None, None] + (bn_beta - bn_mean * scale)[None, :, None, None]
    y = jnp.maximum(y, 0.0)
    sq = y.mean(axis=(2, 3))                                 # (B, Cout)
    h = jnp.maximum(sq @ fc1_w.T, 0.0)                       # (B, Mid)
    w = jax.nn.sigmoid(h @ fc2_w.T)                          # (B, Cout)
    return y * w[:, :, None, None]


if __name__ == "__main__":
    B, Cin, Cout, H, W = 2, 4, 8, 16, 16
    Mid = max(Cout // 4, 1)

    key = jax.random.PRNGKey(0)
    kx, kc, kg, kb, km, kv, k1, k2, kx2 = jax.random.split(key, 9)

    x = jax.random.normal(kx, (B, Cin, H, W), dtype=jnp.float32)
    conv_w = jax.random.normal(kc, (Cout, Cin), dtype=jnp.float32) * 0.3
    bn_gamma = 1.0 + 0.1 * jax.random.normal(kg, (Cout,), dtype=jnp.float32)
    bn_beta = 0.1 * jax.random.normal(kb, (Cout,), dtype=jnp.float32)
    bn_mean = 0.05 * jax.random.normal(km, (Cout,), dtype=jnp.float32)
    bn_var = jnp.abs(1.0 + 0.1 * jax.random.normal(kv, (Cout,), dtype=jnp.float32))
    fc1_w = jax.random.normal(k1, (Mid, Cout), dtype=jnp.float32) * 0.3
    fc2_w = jax.random.normal(k2, (Cout, Mid), dtype=jnp.float32) * 0.3

    params = (conv_w, bn_gamma, bn_beta, bn_mean, bn_var, fc1_w, fc2_w)
    ref = _reference(x, *params)

    # 1) f32, auto plan (resident-y, single full-S tile): strict comparison.
    out = jax.block_until_ready(ga_edgeconv_attn(x, *params,
                                                 compute_dtype=jnp.float32))
    np.testing.assert_allclose(np.asarray(out), np.asarray(ref), rtol=1e-5, atol=1e-5)

    # 2) f32, S-tiled resident-y path (multi-tile squeeze accumulation + VMEM stash).
    out = jax.block_until_ready(ga_edgeconv_attn(x, *params,
                                                 compute_dtype=jnp.float32,
                                                 s_tile=128, resident_y=True))
    np.testing.assert_allclose(np.asarray(out), np.asarray(ref), rtol=1e-5, atol=1e-5)

    # 3) f32, recompute fallback (the large-S path that re-reads x in pass 1).
    out = jax.block_until_ready(ga_edgeconv_attn(x, *params,
                                                 compute_dtype=jnp.float32,
                                                 s_tile=128, resident_y=False))
    np.testing.assert_allclose(np.asarray(out), np.asarray(ref), rtol=1e-5, atol=1e-5)

    # 4) Non-128-divisible spatial extent: exercises the ceil-div grid +
    #    in-kernel masking of the padded columns in the channel mean.
    H2 = W2 = 12   # S = 144
    x2 = jax.random.normal(kx2, (B, Cin, H2, W2), dtype=jnp.float32)
    ref2 = _reference(x2, *params)
    out2 = jax.block_until_ready(ga_edgeconv_attn(x2, *params,
                                                  compute_dtype=jnp.float32,
                                                  s_tile=128))
    np.testing.assert_allclose(np.asarray(out2), np.asarray(ref2), rtol=1e-5, atol=1e-5)

    # 5) Production default (bf16 streaming, f32 accumulation/gate): loose check.
    out_bf16 = jax.block_until_ready(ga_edgeconv_attn(x, *params))
    np.testing.assert_allclose(np.asarray(out_bf16), np.asarray(ref),
                               rtol=5e-2, atol=5e-2)

    print("KERNEL_OK")
</pallas_src>

<mosaic_0001>
module attributes {stable_mosaic.version = 11 : i64} {
  func.func @kernel(%arg0: i32, %arg1: i32, %arg2: i32, %arg3: memref<1x4x256xf32, #tpu.memory_space<vmem>>, %arg4: memref<8x4xf32, #tpu.memory_space<vmem>>, %arg5: memref<8x1xf32, #tpu.memory_space<vmem>>, %arg6: memref<2x8xf32, #tpu.memory_space<vmem>>, %arg7: memref<8x2xf32, #tpu.memory_space<vmem>>, %arg8: memref<1x8x256xf32, #tpu.memory_space<vmem>>, %arg9: memref<8x256xf32, #tpu.memory_space<vmem>>, %arg10: memref<8x1xf32, #tpu.memory_space<vmem>>, %arg11: memref<8x1xf32, #tpu.memory_space<vmem>>) attributes {dimension_semantics = [#tpu.dimension_semantics<parallel>, #tpu.dimension_semantics<arbitrary>, #tpu.dimension_semantics<arbitrary>], iteration_bounds = array<i64: 2, 2, 1>, scalar_prefetch = 0 : i64, scratch_operands = 3 : i64, tpu.core_type = #tpu.core_type<tc>, window_params = [{transform_indices = @transform_0, window_bounds = array<i64: 1, 4, 256>}, {pipeline_mode = #tpu.pipeline_mode<synchronous>, transform_indices = @transform_1, window_bounds = array<i64: 8, 4>}, {pipeline_mode = #tpu.pipeline_mode<synchronous>, transform_indices = @transform_2, window_bounds = array<i64: 8, 1>}, {pipeline_mode = #tpu.pipeline_mode<synchronous>, transform_indices = @transform_3, window_bounds = array<i64: 2, 8>}, {pipeline_mode = #tpu.pipeline_mode<synchronous>, transform_indices = @transform_4, window_bounds = array<i64: 8, 2>}, {transform_indices = @transform_5, window_bounds = array<i64: 1, 8, 256>}]} {
    %c0_i32 = arith.constant 0 : i32
    %0 = arith.cmpi eq, %arg1, %c0_i32 : i32
    %1 = arith.extui %0 : i1 to i32
    %c0_i32_0 = arith.constant 0 : i32
    %2 = arith.cmpi ne, %1, %c0_i32_0 : i32
    scf.if %2 {
      %c0 = arith.constant 0 : index
      %c0_2 = arith.constant 0 : index
      %6 = vector.load %arg4[%c0, %c0_2] : memref<8x4xf32, #tpu.memory_space<vmem>>, vector<8x4xf32>
      %c0_3 = arith.constant 0 : index
      %c0_4 = arith.constant 0 : index
      %c0_5 = arith.constant 0 : index
      %7 = vector.load %arg3[%c0_3, %c0_4, %c0_5] : memref<1x4x256xf32, #tpu.memory_space<vmem>>, vector<1x4x256xf32>
      %8 = vector.shape_cast %7 : vector<1x4x256xf32> to vector<4x256xf32>
      %cst = arith.constant dense<0.000000e+00> : vector<8x256xf32>
      %9 = tpu.matmul %6, %8, %cst {dimension_numbers = #tpu.dot_dimension_numbers<[1], [0], [0], [1], [0, 0, 1, 1], [], []>} : vector<8x4xf32>, vector<4x256xf32>, vector<8x256xf32> -> vector<8x256xf32>
      %c0_6 = arith.constant 0 : index
      %c0_7 = arith.constant 0 : index
      %10 = vector.load %arg5[%c0_6, %c0_7] : memref<8x1xf32, #tpu.memory_space<vmem>>, vector<8x1xf32>
      %11 = vector.broadcast %10 : vector<8x1xf32> to vector<8x256xf32>
      %12 = arith.addf %9, %11 : vector<8x256xf32>
      %cst_8 = arith.constant 0.000000e+00 : f32
      %13 = vector.broadcast %cst_8 : f32 to vector<8x256xf32>
      %14 = arith.maximumf %12, %13 : vector<8x256xf32>
      %c256_i32 = arith.constant 256 : i32
      %15 = arith.muli %arg2, %c256_i32 : i32
      %16 = tpu.iota {dimensions = array<i32: 1>} : vector<8x256xi32>
      %17 = vector.broadcast %15 : i32 to vector<8x256xi32>
      %18 = arith.addi %17, %16 : vector<8x256xi32>
      %c256_i32_9 = arith.constant 256 : i32
      %19 = vector.broadcast %c256_i32_9 : i32 to vector<8x256xi32>
      %20 = arith.cmpi slt, %18, %19 : vector<8x256xi32>
      %cst_10 = arith.constant 0.000000e+00 : f32
      %21 = vector.broadcast %cst_10 : f32 to vector<8x256xf32>
      %22 = arith.select %20, %14, %21 : vector<8x256xi1>, vector<8x256xf32>
      %c256_i32_11 = arith.constant 256 : i32
      %23 = arith.muli %arg2, %c256_i32_11 : i32
      %24 = tpu.assume_multiple %23, 256 : i32
      %c0_12 = arith.constant 0 : index
      %25 = arith.index_cast %24 : i32 to index
      %26 = vector.load %arg9[%c0_12, %25] : memref<8x256xf32, #tpu.memory_space<vmem>>, vector<8x256xf32>
      tpu.vector_store %arg9[%c0_12, %25], %22 {strides = array<i32>} : memref<8x256xf32, #tpu.memory_space<vmem>>, vector<8x256xf32>,
      %c0_i32_13 = arith.constant 0 : i32
      %27 = arith.cmpi eq, %arg2, %c0_i32_13 : i32
      %28 = arith.extui %27 : i1 to i32
      %c0_i32_14 = arith.constant 0 : i32
      %29 = arith.cmpi ne, %28, %c0_i32_14 : i32
      scf.if %29 {
        %cst_22 = arith.constant 0.000000e+00 : f32
        %38 = vector.broadcast %cst_22 : f32 to vector<8x1xf32>
        %c0_23 = arith.constant 0 : index
        %c0_24 = arith.constant 0 : index
        %39 = vector.load %arg10[%c0_23, %c0_24] : memref<8x1xf32, #tpu.memory_space<vmem>>, vector<8x1xf32>
        tpu.vector_store %arg10[%c0_23, %c0_24], %38 {strides = array<i32>} : memref<8x1xf32, #tpu.memory_space<vmem>>, vector<8x1xf32>,
      } else {
      }
      %c0_15 = arith.constant 0 : index
      %c0_16 = arith.constant 0 : index
      %30 = vector.load %arg10[%c0_15, %c0_16] : memref<8x1xf32, #tpu.memory_space<vmem>>, vector<8x1xf32>
      %cst_17 = arith.constant dense<0.000000e+00> : vector<8xf32>
      %31 = vector.multi_reduction <add>, %22, %cst_17 [1] : vector<8x256xf32> to vector<8xf32>
      %32 = vector.shape_cast %31 : vector<8xf32> to vector<8x1xf32>
      %33 = arith.addf %30, %32 : vector<8x1xf32>
      %c0_18 = arith.constant 0 : index
      %c0_19 = arith.constant 0 : index
      %34 = vector.load %arg10[%c0_18, %c0_19] : memref<8x1xf32, #tpu.memory_space<vmem>>, vector<8x1xf32>
      tpu.vector_store %arg10[%c0_18, %c0_19], %33 {strides = array<i32>} : memref<8x1xf32, #tpu.memory_space<vmem>>, vector<8x1xf32>,
      %c0_i32_20 = arith.constant 0 : i32
      %35 = arith.cmpi eq, %arg2, %c0_i32_20 : i32
      %36 = arith.extui %35 : i1 to i32
      %c0_i32_21 = arith.constant 0 : i32
      %37 = arith.cmpi ne, %36, %c0_i32_21 : i32
      scf.if %37 {
        %c0_22 = arith.constant 0 : index
        %c0_23 = arith.constant 0 : index
        %38 = vector.load %arg10[%c0_22, %c0_23] : memref<8x1xf32, #tpu.memory_space<vmem>>, vector<8x1xf32>
        %cst_24 = arith.constant 3.906250e-03 : f32
        %39 = vector.broadcast %cst_24 : f32 to vector<8x1xf32>
        %40 = arith.mulf %38, %39 : vector<8x1xf32>
        %c0_25 = arith.constant 0 : index
        %c0_26 = arith.constant 0 : index
        %41 = vector.load %arg6[%c0_25, %c0_26] : memref<2x8xf32, #tpu.memory_space<vmem>>, vector<2x8xf32>
        %cst_27 = arith.constant dense<0.000000e+00> : vector<2x1xf32>
        %42 = tpu.matmul %41, %40, %cst_27 {dimension_numbers = #tpu.dot_dimension_numbers<[1], [0], [0], [1], [0, 0, 1, 1], [], []>} : vector<2x8xf32>, vector<8x1xf32>, vector<2x1xf32> -> vector<2x1xf32>
        %cst_28 = arith.constant 0.000000e+00 : f32
        %43 = vector.broadcast %cst_28 : f32 to vector<2x1xf32>
        %44 = arith.maximumf %42, %43 : vector<2x1xf32>
        %c0_29 = arith.constant 0 : index
        %c0_30 = arith.constant 0 : index
        %45 = vector.load %arg7[%c0_29, %c0_30] : memref<8x2xf32, #tpu.memory_space<vmem>>, vector<8x2xf32>
        %cst_31 = arith.constant dense<0.000000e+00> : vector<8x1xf32>
        %46 = tpu.matmul %45, %44, %cst_31 {dimension_numbers = #tpu.dot_dimension_numbers<[1], [0], [0], [1], [0, 0, 1, 1], [], []>} : vector<8x2xf32>, vector<2x1xf32>, vector<8x1xf32> -> vector<8x1xf32>
        %47 = arith.negf %46 : vector<8x1xf32>
        %48 = math.exp %47 : vector<8x1xf32>
        %cst_32 = arith.constant 1.000000e+00 : f32
        %49 = vector.broadcast %cst_32 : f32 to vector<8x1xf32>
        %50 = arith.addf %49, %48 : vector<8x1xf32>
        %51 = arith.divf %49, %50 : vector<8x1xf32>
        %c0_33 = arith.constant 0 : index
        %c0_34 = arith.constant 0 : index
        %52 = vector.load %arg11[%c0_33, %c0_34] : memref<8x1xf32, #tpu.memory_space<vmem>>, vector<8x1xf32>
        tpu.vector_store %arg11[%c0_33, %c0_34], %51 {strides = array<i32>} : memref<8x1xf32, #tpu.memory_space<vmem>>, vector<8x1xf32>,
      } else {
      }
    } else {
    }
    %c1_i32 = arith.constant 1 : i32
    %3 = arith.cmpi eq, %arg1, %c1_i32 : i32
    %4 = arith.extui %3 : i1 to i32
    %c0_i32_1 = arith.constant 0 : i32
    %5 = arith.cmpi ne, %4, %c0_i32_1 : i32
    scf.if %5 {
      %c256_i32 = arith.constant 256 : i32
      %6 = arith.muli %arg2, %c256_i32 : i32
      %7 = tpu.assume_multiple %6, 256 : i32
      %c0 = arith.constant 0 : index
      %8 = arith.index_cast %7 : i32 to index
      %9 = vector.load %arg9[%c0, %8] : memref<8x256xf32, #tpu.memory_space<vmem>>, vector<8x256xf32>
      %c0_2 = arith.constant 0 : index
      %c0_3 = arith.constant 0 : index
      %10 = vector.load %arg11[%c0_2, %c0_3] : memref<8x1xf32, #tpu.memory_space<vmem>>, vector<8x1xf32>
      %11 = vector.broadcast %10 : vector<8x1xf32> to vector<8x256xf32>
      %12 = arith.mulf %9, %11 : vector<8x256xf32>
      %c0_4 = arith.constant 0 : index
      %c0_5 = arith.constant 0 : index
      %c0_6 = arith.constant 0 : index
      %13 = vector.load %arg8[%c0_4, %c0_5, %c0_6] : memref<1x8x256xf32, #tpu.memory_space<vmem>>, vector<1x8x256xf32>
      %14 = vector.shape_cast %13 : vector<1x8x256xf32> to vector<8x256xf32>
      %15 = vector.shape_cast %12 : vector<8x256xf32> to vector<1x8x256xf32>
      tpu.vector_store %arg8[%c0_4, %c0_5, %c0_6], %15 {strides = array<i32>} : memref<1x8x256xf32, #tpu.memory_space<vmem>>, vector<1x8x256xf32>,
    } else {
    }
    return
  }
  func.func @transform_0(%arg0: i32, %arg1: i32, %arg2: i32) -> (i32, i32, i32) {
    %c1_i32 = arith.constant 1 : i32
    %0 = arith.subi %c1_i32, %arg1 : i32
    %1 = arith.muli %arg2, %0 : i32
    %c0_i32 = arith.constant 0 : i32
    %2 = arith.muli %c0_i32, %arg1 : i32
    %3 = arith.addi %1, %2 : i32
    %c0_i32_0 = arith.constant 0 : i32
    %c0_i32_1 = arith.constant 0 : i32
    return %arg0, %c0_i32_0, %3 : i32, i32, i32
  }
  func.func @transform_1(%arg0: i32, %arg1: i32, %arg2: i32) -> (i32, i32) {
    %c0_i32 = arith.constant 0 : i32
    %c0_i32_0 = arith.constant 0 : i32
    %c0_i32_1 = arith.constant 0 : i32
    return %c0_i32, %c0_i32_0 : i32, i32
  }
  func.func @transform_2(%arg0: i32, %arg1: i32, %arg2: i32) -> (i32, i32) {
    %c0_i32 = arith.constant 0 : i32
    %c0_i32_0 = arith.constant 0 : i32
    %c0_i32_1 = arith.constant 0 : i32
    return %c0_i32, %c0_i32_0 : i32, i32
  }
  func.func @transform_3(%arg0: i32, %arg1: i32, %arg2: i32) -> (i32, i32) {
    %c0_i32 = arith.constant 0 : i32
    %c0_i32_0 = arith.constant 0 : i32
    %c0_i32_1 = arith.constant 0 : i32
    return %c0_i32, %c0_i32_0 : i32, i32
  }
  func.func @transform_4(%arg0: i32, %arg1: i32, %arg2: i32) -> (i32, i32) {
    %c0_i32 = arith.constant 0 : i32
    %c0_i32_0 = arith.constant 0 : i32
    %c0_i32_1 = arith.constant 0 : i32
    return %c0_i32, %c0_i32_0 : i32, i32
  }
  func.func @transform_5(%arg0: i32, %arg1: i32, %arg2: i32) -> (i32, i32, i32) {
    %0 = arith.muli %arg1, %arg2 : i32
    %c0_i32 = arith.constant 0 : i32
    %c0_i32_0 = arith.constant 0 : i32
    return %arg0, %c0_i32, %0 : i32, i32, i32
  }
}

</mosaic_0001>

<bundles_post_ra>
// kernel: tpu_custom_call.1
= control target key start
LH: loop header
LB: loop body
LE: loop exit
PB: predicated region body
PF: predicated region fallthrough
CT: control target
= control target key end

     0   :  { %10 = vsyncpa [#allocation6], 0  ;;  %s1090_s0 = inlined_call_operand.vmem [shape: f32[2,4,256], index: 0, kind: input, shape index: {}]   ;;  %s1091_s1 = inlined_call_operand.vmem [shape: f32[8,4], index: 1, kind: input, shape index: {}]   ;;  %s1092_s2 = inlined_call_operand.vmem [shape: f32[8,1], index: 2, kind: input, shape index: {}]   ;;  %s1093_s3 = inlined_call_operand.vmem [shape: f32[2,8], index: 3, kind: input, shape index: {}]   ;;  %s1094_s4 = inlined_call_operand.vmem [shape: f32[8,2], index: 4, kind: input, shape index: {}]   ;;  %s1095_s5 = inlined_call_operand.hbm [shape: f32[2,8,256], index: 5, kind: output, shape index: {}]  }
   0x1   :  { %12 = vsyncpa [#allocation6 + $0x1], 0  ;;  %s945_s18 = smov 0   ;;  %s947_s19 = smov 0  }
   0x2   :  { %s949_s20 = smov 0   ;;  %s951_s21 = smov 0  }
   0x3   :  { %s953_s22 = smov 0   ;;  %s955_s23 = smov 0  }
   0x4   :  { %s957_s24 = smov 0   ;;  %s959_s25 = smov 0  }
   0x5 LB: > { %s696_s26 = sadd.s32 4294967295, %s908_s25   ;;  %s697_s27 = sadd.s32 4294967294, %s908_s25   ;;  %s908_s25 = sphi %s959_s25, %s18_s25   ;;  %s904_s24 = sphi %s957_s24, %s1104_s24   ;;  %s900_s23 = sphi %s955_s23, %s1103_s23   ;;  %s896_s22 = sphi %s953_s22, %s1102_s22   ;;  %s892_s21 = sphi %s951_s21, %s1101_s21   ;;  %s888_s20 = sphi %s949_s20, %s1100_s20   ;;  %s884_s19 = sphi %s947_s19, %s1099_s19   ;;  %s880_s18 = sphi %s945_s18, %s1098_s18  }
   0x6   : > { %s33_s28 = sadd.s32 1, %s900_s23  ;;  %s37_s29 = sadd.s32 1, %s904_s24 }
   0x7   : > { %p35_p0 = scmp.ge.s32.totalorder %s33_s28, 2  ;;  %p174_p1 = scmp.ne.s32.totalorder %s888_s20, %s884_s19 }
   0x8   : > { %p175_p2 = scmp.eq.s32.totalorder %s696_s26, 3  ;;  %p180_p4 = scmp.ne.s32.totalorder %s884_s19, %s880_s18 }
   0x9   : > { %s1106_s28 = smov (%p35_p0, %s33_s28), 0  ;;  %s1108_s29 = smov (!%p35_p0, %s37_s29), %s904_s24 }
   0xa   : > { %p994_p3 = por %p175_p2, %p174_p1  ;;  %p39_p5 = scmp.ge.s32.totalorder %s1108_s29, 2 }
   0xb   : > { %p181_p6 = scmp.eq.s32.totalorder %s697_s27, 3  ;;  %p700_p7 = scmp.ge.s32.totalorder %s908_s25, 1 }
   0xc   : > { %p228_p8 = scmp.lt.s32.totalorder %s908_s25, 5  ;;  %s1110_s29 = smov (%p39_p5, %s1108_s29), 0 }
   0xd   : > { %p1004_p9 = por %p181_p6, %p180_p4  ;;  %s159_s7 = ssub.s32 %s904_s24, %s1110_s29 }
   0xe   : > { %p229_p10 = pnand %p700_p7, %p228_p8  ;;  %s164_s8 = sadd.s32 1, %s888_s20 }
   0xf   : > { %p162_p11 = scmp.eq.s32.totalorder %s159_s7, 0  ;;  %s259_s10 = sand.u32 (!%p229_p10), 1, %s884_s19  }
  0x10   : > { %232 = sbr.rel (%p229_p10) target bundleno = 965 (0x3c5), region = 40  ;;  %p265_p12 = scmp.lt.s32.totalorder (!%p229_p10), %s896_s22, 1 }
  0x11   : > { %s1012_s9 = scalar_select %p162_p11, %s888_s20, %s164_s8  }
  0x12   : > { %s701_s11 = sshll.u32 (!%p229_p10), %s259_s10, 4  ;;  %p704_p13 = scmp.ne.s32.totalorder (!%p229_p10), %s892_s21, 0 }
  0x13   : > { %s1022_s17 = scalar_lea.vmem (!%p229_p10), [#allocation5], %s701_s11 }
  0x15   : > { %s266_s12 = scalar_select %p265_p12, %s896_s22, 1 }
  0x16   : > { %281 = sbr.rel (%p704_p13) target bundleno = 806 (0x326), region = 44 }
  0x17   : > { %s718_s13 = sshll.u32 %s266_s12, 3 }
  0x18   : > { %s272_s16 = scalar_lea.vmem %s1090_s0, %s718_s13 }
  0x1b   : > { %v283_v0 = vld [vmem:[%s272_s16] sm:$0xff]  ;;  %vm296_vm0 = vcmask 1043456   ;;  %v910_v2 = vmov 0.0   ;;  %v911_v3 = vmov 0   ;;  %vm292_vm1 = vcmask 31744  }
  0x1c   : > { %v291_v1 = vcombine.high %v283_v0, %v283_v0  ;;  %365 = vmatprep.mubr.f32.mxu0 %v910_v2  ;;  %809 = vset.pattern.permute.xlu0 %v911_v3  ;;  %v284_v4 = vld [vmem:[%s1092_s2] sm:$0xff]  ;;  %vm395_vm2 = vcmask 7168   ;;  %vm912_vm3 = vmmov 0   ;;  %vm410_vm4 = vcmask 64512  }
  0x1d   : > { %v282_v5 = vld [vmem:[%s1091_s1] sm:$0xff]  ;;  %287 = vperm.xlu0 %809, %v284_v4   ;;  %724 = vmatprep.subr.mxu1 %v910_v2  ;;  %396 = vst.msk [vmem:[#allocation3] sm:$0xff] %vm395_vm2, %v910_v2  ;;  %vm490_vm5 = vcmask 1041408   ;;  %vm486_vm6 = vcmask 15360  }
  0x1e   : > { %705 = vmatprep.subr.msk.mxu0 %vm296_vm0, %v291_v1  ;;  %726 = vmatprep.mubr.msk.f32.mxu1 %vm912_vm3, %v910_v2  ;;  %v409_v19 = vld [vmem:[%s1093_s3] sm:$0x3] }
  0x1f   : > { %706 = vmatpush1.msk.msra.mxu0 %vm296_vm0, %v283_v0  ;;  %v485_v22 = vld [vmem:[%s1094_s4] sm:$0xff] }
  0x20   : > { %707 = vmatmul.mubr.msk.f32.vlgmr.msra.gmra.mxu0 %vm292_vm1, %v282_v5  ;;  %729 = vmatprep.subr.mxu0 %v910_v2 }
  0x21   : > { %731 = vmatprep.mubr.msk.f32.mxu0 %vm912_vm3, %v910_v2 }
  0x24   : > { %v397_v14 = vld [vmem:[#allocation3] sm:$0xff] }
  0x98   : > { %v288_v6 = vpop.permute.xlu0 %287 }
  0xe0   : > { %v367_v7 = vpop.f32.mrf.mxu0 }
  0xe1   : > { %v368_v8 = vadd.f32 %v367_v7, %v288_v6 }
  0xe2   : > { %v369_v9 = vpop.f32.mrf.mxu0 }
  0xe3   : > { %v372_v10 = vmax.f32 %v368_v8, 0.0  ;;  %v370_v11 = vadd.f32 %v369_v9, %v288_v6 }
  0xe5   : > { %389 = vst [vmem:[#allocation2] sm:$0xff] %v372_v10  ;;  %v373_v12 = vmax.f32 %v370_v11, 0.0 }
  0xe7   : > { %390 = vst [vmem:[#allocation2 + $0x8] sm:$0xff] %v373_v12  ;;  %v398_v13 = vadd.f32 %v373_v12, %v372_v10 }
  0xe9   : > { %399 = vadd.xlane.f32.xlu0 %v398_v13 }
 0x172   : > { %v400_v15 = vpop.xlane.xlu0 %399 }
 0x173   : > { %v401_v16 = vadd.f32 %v400_v15, %v397_v14 }
 0x175   : > { %403 = vst.msk [vmem:[#allocation3] sm:$0xff] %vm395_vm2, %v401_v16 }
 0x17c   : > { %v407_v17 = vld [vmem:[#allocation3] sm:$0xff] }
 0x17d   : > { %v408_v18 = vmul.f32 0.00390625, %v407_v17 }
 0x17f   : > { %725 = vmatpush3.msra.mxu1 %v408_v18 }
 0x180   : > { %727 = vmatmul.mubr.msk.f32.vlgmr.msra.gmra.mxu1 %vm410_vm4, %v409_v19 }
 0x240   : > { %v480_v20 = vpop.f32.mrf.mxu1 }
 0x241   : > { %v484_v21 = vmax.f32 %v480_v20, 0.0 }
 0x242   : > { %v728_v23 = vpop.f32.mrf.mxu1 }
 0x243   : > { %730 = vmatpush3.msk.msra.mxu0 %vm490_vm5, %v484_v21 }
 0x244   : > { %732 = vmatmul.mubr.msk.f32.vlgmr.msra.gmra.mxu0 %vm486_vm6, %v485_v22 }
 0x304   : > { %v560_v24 = vpop.f32.mrf.mxu0 }
 0x305   : > { %v711_v25 = vmul.f32 -1.442695, %v560_v24 }
 0x306   : > { %v733_v26 = vpop.f32.mrf.mxu0 }
 0x307   : > { %811 = vpow2.f32 %v711_v25 }
 0x314   : > { %v812_v27 = vpop.eup %811 }
 0x315   : > { %v567_v28 = vadd.f32 1.0, %v812_v27 }
 0x317   : > { %813 = vrcp.f32 %v567_v28 }
 0x324   : > { %v814_v29 = vpop.eup %813 }
 0x325   : > { %570 = vst.msk [vmem:[#allocation4] sm:$0xff] %vm395_vm2, %v814_v29 }
 0x326 PF: > { %p712_p0 = scmp.ne.s32.totalorder %s892_s21, 1 }
 0x328   : > { %574 = sbr.rel (%p712_p0) target bundleno = 942 (0x3ae), region = 56 }
 0x32d   : > { %v582_v30 = vld [vmem:[#allocation4] sm:$0xff]  ;;  %v913_v31 = vmov 0   ;;  %v580_v32 = vld [vmem:[#allocation2] sm:$0xff]  ;;  %v581_v33 = vld [vmem:[#allocation2 + $0x8] sm:$0xff] }
 0x32e   : > { %815 = vset.pattern.permute.xlu0 %v913_v31 }
 0x32f   : > { %585 = vperm.xlu0 %815, %v582_v30  }
 0x3aa   : > { %v586_v34 = vpop.permute.xlu0 %585 }
 0x3ab   : > { %v588_v35 = vmul.f32 %v586_v34, %v580_v32  ;;  %v589_v36 = vmul.f32 %v586_v34, %v581_v33 }
 0x3ad   : > { %590 = vst [vmem:[%s1022_s17] sm:$0xff] %v588_v35  ;;  %591 = vst [vmem:[%s1022_s17 + $0x8] sm:$0xff] %v589_v36 }
 0x3ae PF: > { %s719_s21 = sshll.u32 %s896_s22, 8  ;;  %s610_s27 = sshll.u32 %s1022_s17, 4  ;;  %s611_s27 = int_to_ptr.vmem [resolvable:$true] %s610_s27 }
 0x3af   : > { %s608_s26 = scalar_lea.hbm %s1095_s5, %s719_s21  ;;  %s593_s7 = scalar_lea.sflag [#allocation6], %s259_s10 }
 0x3b0   : > { %s816_s8 = scalar_lea.vmem %s611_s27, 256  ;;  %s914_s11 = smov [#allocation5]  }
 0x3b1   : > { %p817_p1 = scmp.ne.s32.totalorder %s611_s27, %s816_s8  ;;  %s820_s12 = sshll.u32 %s914_s11, 4  ;;  %s821_s12 = int_to_ptr.vmem [resolvable:$false] %s820_s12 }
 0x3b2   : > { %s822_s13 = scalar_lea.vmem %s821_s12, 512  ;;  %p823_p5 = scmp.lt.s32.totalorder %s611_s27, %s821_s12 }
 0x3b3   : > { %p818_p2 = pnand %p817_p1, %p994_p3  ;;  %p824_p6 = scmp.lt.s32.totalorder %s822_s13, %s816_s8 }
 0x3b5   : > { %p819_p4 = pneg %p818_p2  ;;  %p825_p7 = por %p824_p6, %p823_p5 }
 0x3b7   : > { %p826_p8 = pnand %p825_p7, %p819_p4 }
 0x3b9   : > { %829 = shalt.err (!%p826_p8)
}
 0x3ba   : > { %s830_s22 = scalar_lea.hbm %s608_s26, 256  ;;  %s834_s14 = scalar_lea.hbm %s1095_s5, 512 }
 0x3bb   : > { %p831_p10 = scmp.ne.s32.totalorder %s608_s26, %s830_s22  ;;  %p835_p13 = scmp.lt.s32.totalorder %s608_s26, %s1095_s5 }
 0x3bc   : > { %p836_p0 = scmp.lt.s32.totalorder %s834_s14, %s830_s22 }
 0x3bd   : > { %p832_p11 = pnand %p831_p10, %p994_p3 }
 0x3be   : > { %p837_p1 = por %p836_p0, %p835_p13 }
 0x3bf   : > { %p833_p12 = pneg %p832_p11 }
 0x3c1   : > { %p838_p2 = pnand %p837_p1, %p833_p12 }
 0x3c3   : > { %841 = shalt.err (!%p838_p2)
}
 0x3c4   : > { %734 = dma.vmem_to_hbm [thread:$0]  (%p994_p3), %s611_s27, 256, %s608_s26, %s593_s7  }
 0x3c5 PF: > { %p740_p4 = scmp.ge.s32.totalorder %s908_s25, 2  ;;  %s622_s16 = sand.u32 1, %s880_s18  }
 0x3c6   : > { %s623_s8 = scalar_lea.sflag [#allocation6], %s622_s16 }
 0x3c7   : > { %p737_p5 = pnand %p740_p4, %p1004_p9 }
 0x3c9   : > { %p738_p6 = pneg %p737_p5 }
 0x3cb   : > { %875 = dma.done.wait (%p738_p6), %s623_s8, 256  }
 0x3cc   : > { %877 = vsyncadd (%p738_p6), %s623_s8, 4294967040  ;;  %s18_s25 = sadd.s32 1, %s908_s25   ;;  %s1098_s18 = smov %s884_s19 }
 0x3cd   : > { %p15_p7 = scmp.ge.s32.totalorder %s18_s25, 6   ;;  %s1099_s19 = smov %s888_s20 }
 0x3ce   : > { %s1100_s20 = smov %s1012_s9  ;;  %s1101_s21 = smov %s900_s23 }
 0x3cf   : > { %s1102_s22 = smov %s904_s24  ;;  %s1103_s23 = smov %s1106_s28 }
 0x3d0   : > { %s1104_s24 = smov %s1110_s29  ;;  %17 = sbr.rel (!%p15_p7) target bundleno = 5 (0x5), region = 93 }
 0x3d5   :  { %628 = vsyncpa [#allocation6], 1 }
 0x3d6   :  { %630 = vsyncpa [#allocation6 + $0x1], 1 }

</bundles_post_ra>
